<compile_context>
chip_gen: v6e
topology: v6e:2x2x1
jax: 0.10.0
libtpu: 0.0.40
codegen_flags: <defaults>
</compile_context>

<pallas_src>
import functools

import jax
import jax.numpy as jnp
from jax.experimental import pallas as pl
from jax.experimental.pallas import tpu as pltpu

# ---- model hyper-parameters (small, consistent with the module) ----
B = 2            # batch (real)
B_PAD = 8        # padded batch = one full sublane group
T = 8            # sequence_length = data_resolution_nth_note * data_length_bars
N_NOTE = 16      # n_note_class = data_note_high - data_note_low + 1
H_ENC = 32       # cmp_enc_rnn_hidden_size
Z = 16           # cmp_hidden_size (latent)
H_DEC = 32       # cmp_dec_rnn_hidden_size

# ---- packed-parameter slab layout (row offsets; every block starts 8-row aligned) ----
LANES = 128
R_WIH_E = 0        # (N_NOTE, H_ENC) = (16, 32)   encoder W_ih^T
R_WHH_E = 16       # (H_ENC, H_ENC)  = (32, 32)   encoder W_hh^T
R_B_E = 48         # (1, H_ENC)                   bih_e + bhh_e
R_W_F = 56         # (H_ENC, H_DEC)  = (32, 32)   fused  Wfc_e^T @ Wih_d^T
R_B_F = 88         # (1, H_DEC)                   fused bias
R_WHH_D = 96       # (H_DEC, H_DEC)  = (32, 32)   decoder W_hh^T
R_WFCD = 128       # (H_DEC, N_NOTE) = (32, 16)   decoder output FC W^T
R_B_OUT = 160      # (1, T*N_NOTE)   = (1, 128)   decoder FC bias tiled over T
R_TOTAL = 168


def _autoencoder_kernel(x_ref, p_ref, out_ref):
    """x_ref: (T*B_PAD, N_NOTE) time-major input; p_ref: (R_TOTAL, 128) packed params;
    out_ref: (B_PAD, T*N_NOTE)."""
    f32 = jnp.float32
    bf16 = jnp.bfloat16

    # Static views into the packed parameter slab (cheap static slices, one DMA'd buffer).
    wih_eT = p_ref[R_WIH_E:R_WIH_E + N_NOTE, 0:H_ENC]        # (N_NOTE, H_ENC)
    whh_eT = p_ref[R_WHH_E:R_WHH_E + H_ENC, 0:H_ENC]         # (H_ENC, H_ENC)
    b_e = p_ref[R_B_E:R_B_E + 1, 0:H_ENC]                    # (1, H_ENC)
    w_fT = p_ref[R_W_F:R_W_F + H_ENC, 0:H_DEC]               # (H_ENC, H_DEC)
    b_f = p_ref[R_B_F:R_B_F + 1, 0:H_DEC]                    # (1, H_DEC)
    whh_dT = p_ref[R_WHH_D:R_WHH_D + H_DEC, 0:H_DEC]         # (H_DEC, H_DEC)
    wfc_dT = p_ref[R_WFCD:R_WFCD + H_DEC, 0:N_NOTE]          # (H_DEC, N_NOTE)
    b_out = p_ref[R_B_OUT:R_B_OUT + 1, 0:T * N_NOTE]         # (1, 128)

    # Hoisted one-time bf16 casts of the loop-invariant recurrence weights.
    whh_e_bf = whh_eT.astype(bf16)
    whh_d_bf = whh_dT.astype(bf16)

    # ---------------- Encoder ----------------
    # Batched input projection: ONE MXU dot for all T steps (bias folded in once).
    xw = jnp.dot(x_ref[...], wih_eT, preferred_element_type=f32) + b_e   # (T*B_PAD, H_ENC)

    # Serial recurrence (critical path): bf16 operands, f32 accumulation, sublane-aligned slices.
    h = jnp.zeros((B_PAD, H_ENC), f32)
    for t in range(T):
        hh = jnp.dot(h.astype(bf16), whh_e_bf, preferred_element_type=f32)
        h = jnp.tanh(xw[t * B_PAD:(t + 1) * B_PAD, :] + hh)

    # ---- Encoder FC fused with the step-invariant decoder input projection ----
    pre = jnp.dot(h, w_fT, preferred_element_type=f32) + b_f             # (B_PAD, H_DEC)

    # ---------------- Decoder ----------------
    # Only the hidden-hidden dot is serial; the per-step output dot is off the chain
    # and its results are kept in registers (no VMEM scratch round trip).
    hd = jnp.zeros((B_PAD, H_DEC), f32)
    ys = []
    for t in range(T):
        hd = jnp.tanh(pre + jnp.dot(hd.astype(bf16), whh_d_bf,
                                    preferred_element_type=f32))
        ys.append(jnp.dot(hd, wfc_dT, preferred_element_type=f32))       # (B_PAD, N_NOTE)

    # One lane concat + single lane-dense (8, 128) store.
    out_ref[...] = (jnp.concatenate(ys, axis=1) + b_out).astype(out_ref.dtype)


@jax.jit
def autoencoder_forward(x, packed_params):
    """x: (B, T, N_NOTE) float32 -> logits (B*T, N_NOTE) (matches .reshape(-1, n))."""
    # Time-major, batch padded to 8 (zero rows) so every per-step slice is sublane-aligned.
    x_tm = jnp.transpose(x.astype(jnp.float32), (1, 0, 2))               # (T, B, N)
    x_tm = jnp.pad(x_tm, ((0, 0), (0, B_PAD - B), (0, 0)))               # (T, B_PAD, N)
    x_tm = x_tm.reshape(T * B_PAD, N_NOTE)

    vmem = pl.BlockSpec(memory_space=pltpu.MemorySpace.VMEM)
    out = pl.pallas_call(
        _autoencoder_kernel,
        out_shape=jax.ShapeDtypeStruct((B_PAD, T * N_NOTE), jnp.float32),
        in_specs=[vmem, vmem],
        out_specs=vmem,
        cost_estimate=pl.CostEstimate(flops=300_000,
                                      transcendentals=512,
                                      bytes_accessed=200_000),
    )(x_tm, packed_params)
    # Drop padded rows; (B, T*N_NOTE) row-major == (B, T, N_NOTE) -> same flattening.
    return out[:B].reshape(B * T, N_NOTE)


def pack_params(params):
    """One-time host-side prep: transpose weights, sum/fuse biases, fuse the
    encoder-FC with the decoder input projection, and pack everything into a
    single (R_TOTAL, 128) f32 slab (no block-diagonal kron weight)."""
    f32 = jnp.float32
    wih_eT = params["wih_e"].T.astype(f32)                          # (N_NOTE, H_ENC)
    whh_eT = params["whh_e"].T.astype(f32)                          # (H_ENC, H_ENC)
    b_e = (params["bih_e"] + params["bhh_e"]).astype(f32)           # (1, H_ENC)
    # pre = (h @ Wfc_e^T + bfc_e) @ Wih_d^T + bih_d + bhh_d
    #     = h @ (Wfc_e^T @ Wih_d^T) + (bfc_e @ Wih_d^T + bih_d + bhh_d)
    w_fT = (params["wfc_e"].T @ params["wih_d"].T).astype(f32)      # (H_ENC, H_DEC)
    b_f = (params["bfc_e"] @ params["wih_d"].T
           + params["bih_d"] + params["bhh_d"]).astype(f32)         # (1, H_DEC)
    whh_dT = params["whh_d"].T.astype(f32)                          # (H_DEC, H_DEC)
    wfc_dT = params["wfc_d"].T.astype(f32)                          # (H_DEC, N_NOTE)
    b_out = jnp.tile(params["bfc_d"].astype(f32), (1, T))           # (1, T*N_NOTE)

    slab = jnp.zeros((R_TOTAL, LANES), f32)

    def put(s, row, blk):
        r, c = blk.shape
        return s.at[row:row + r, 0:c].set(blk)

    slab = put(slab, R_WIH_E, wih_eT)
    slab = put(slab, R_WHH_E, whh_eT)
    slab = put(slab, R_B_E, b_e)
    slab = put(slab, R_W_F, w_fT)
    slab = put(slab, R_B_F, b_f)
    slab = put(slab, R_WHH_D, whh_dT)
    slab = put(slab, R_WFCD, wfc_dT)
    slab = put(slab, R_B_OUT, b_out)
    return slab


def init_params(key):
    """Deterministic parameter init (uniform, PyTorch-like shapes)."""
    ks = jax.random.split(key, 13)

    def u(k, shape, fan):
        bound = 1.0 / jnp.sqrt(jnp.float32(fan))
        return jax.random.uniform(k, shape, jnp.float32, -bound, bound)

    return {
        # encoder RNN (input N_NOTE -> hidden H_ENC)
        "wih_e": u(ks[0], (H_ENC, N_NOTE), H_ENC),
        "whh_e": u(ks[1], (H_ENC, H_ENC), H_ENC),
        "bih_e": u(ks[2], (1, H_ENC), H_ENC),
        "bhh_e": u(ks[3], (1, H_ENC), H_ENC),
        # encoder fc (H_ENC -> Z)
        "wfc_e": u(ks[4], (Z, H_ENC), H_ENC),
        "bfc_e": u(ks[5], (1, Z), H_ENC),
        # decoder RNN (input Z -> hidden H_DEC)
        "wih_d": u(ks[6], (H_DEC, Z), H_DEC),
        "whh_d": u(ks[7], (H_DEC, H_DEC), H_DEC),
        "bih_d": u(ks[8], (1, H_DEC), H_DEC),
        "bhh_d": u(ks[9], (1, H_DEC), H_DEC),
        # decoder fc (H_DEC -> N_NOTE)
        "wfc_d": u(ks[10], (N_NOTE, H_DEC), H_DEC),
        "bfc_d": u(ks[11], (1, N_NOTE), H_DEC),
    }


def _reference_forward(x, params):
    """Pure-JAX f32 reference of the PyTorch forward (un-fused, per-step FC)."""
    dot = functools.partial(jnp.dot, precision=jax.lax.Precision.HIGHEST)
    h = jnp.zeros((B, H_ENC), jnp.float32)
    for t in range(T):
        h = jnp.tanh(dot(x[:, t, :], params["wih_e"].T)
                     + dot(h, params["whh_e"].T)
                     + params["bih_e"] + params["bhh_e"])
    z = dot(h, params["wfc_e"].T) + params["bfc_e"]
    hd = jnp.zeros((B, H_DEC), jnp.float32)
    outs = []
    for t in range(T):
        hd = jnp.tanh(dot(z, params["wih_d"].T) + params["bih_d"]
                      + dot(hd, params["whh_d"].T) + params["bhh_d"])
        outs.append(dot(hd, params["wfc_d"].T) + params["bfc_d"])
    return jnp.stack(outs, axis=1).reshape(-1, N_NOTE)


if __name__ == "__main__":
    key = jax.random.PRNGKey(0)
    k_x, k_p = jax.random.split(key)
    # piano-roll-ish binary input, float32
    x = (jax.random.uniform(k_x, (B, T, N_NOTE)) > 0.5).astype(jnp.float32)
    params = init_params(k_p)
    slab = pack_params(params)          # one-time host-side packing / fusion

    out = autoencoder_forward(x, slab)
    jax.block_until_ready(out)
    assert out.shape == (B * T, N_NOTE), out.shape

    ref = _reference_forward(x, params)
    err = float(jnp.max(jnp.abs(out - ref)))
    # bf16 recurrence-dot operands (f32 accumulation) -> tolerance widened per review.
    assert err < 3e-2, f"max abs err {err}"

    print("KERNEL_OK")
</pallas_src>

<mosaic_0001>
module attributes {stable_mosaic.version = 11 : i64} {
  func.func @_autoencoder_kernel(%arg0: memref<64x16xf32, #tpu.memory_space<vmem>>, %arg1: memref<168x128xf32, #tpu.memory_space<vmem>>, %arg2: memref<8x128xf32, #tpu.memory_space<vmem>>) attributes {dimension_semantics = [], scalar_prefetch = 0 : i64, scratch_operands = 0 : i64, tpu.core_type = #tpu.core_type<tc>} {
    %c0 = arith.constant 0 : index
    %c0_0 = arith.constant 0 : index
    %0 = vector.load %arg1[%c0, %c0_0] : memref<168x128xf32, #tpu.memory_space<vmem>>, vector<16x32xf32>
    %c16 = arith.constant 16 : index
    %c0_1 = arith.constant 0 : index
    %1 = vector.load %arg1[%c16, %c0_1] : memref<168x128xf32, #tpu.memory_space<vmem>>, vector<32x32xf32>
    %c48 = arith.constant 48 : index
    %c0_2 = arith.constant 0 : index
    %2 = vector.load %arg1[%c48, %c0_2] : memref<168x128xf32, #tpu.memory_space<vmem>>, vector<1x32xf32>
    %c56 = arith.constant 56 : index
    %c0_3 = arith.constant 0 : index
    %3 = vector.load %arg1[%c56, %c0_3] : memref<168x128xf32, #tpu.memory_space<vmem>>, vector<32x32xf32>
    %c88 = arith.constant 88 : index
    %c0_4 = arith.constant 0 : index
    %4 = vector.load %arg1[%c88, %c0_4] : memref<168x128xf32, #tpu.memory_space<vmem>>, vector<1x32xf32>
    %c96 = arith.constant 96 : index
    %c0_5 = arith.constant 0 : index
    %5 = vector.load %arg1[%c96, %c0_5] : memref<168x128xf32, #tpu.memory_space<vmem>>, vector<32x32xf32>
    %c128 = arith.constant 128 : index
    %c0_6 = arith.constant 0 : index
    %6 = vector.load %arg1[%c128, %c0_6] : memref<168x128xf32, #tpu.memory_space<vmem>>, vector<32x16xf32>
    %c160 = arith.constant 160 : index
    %c0_7 = arith.constant 0 : index
    %7 = vector.load %arg1[%c160, %c0_7] : memref<168x128xf32, #tpu.memory_space<vmem>>, vector<1x128xf32>
    %8 = arith.truncf %1 : vector<32x32xf32> to vector<32x32xbf16>
    %9 = arith.truncf %5 : vector<32x32xf32> to vector<32x32xbf16>
    %c0_8 = arith.constant 0 : index
    %c0_9 = arith.constant 0 : index
    %10 = vector.load %arg0[%c0_8, %c0_9] : memref<64x16xf32, #tpu.memory_space<vmem>>, vector<64x16xf32>
    %cst = arith.constant dense<0.000000e+00> : vector<64x32xf32>
    %11 = tpu.matmul %10, %0, %cst {dimension_numbers = #tpu.dot_dimension_numbers<[1], [0], [0], [1], [0, 0, 1, 1], [], []>} : vector<64x16xf32>, vector<16x32xf32>, vector<64x32xf32> -> vector<64x32xf32>
    %12 = vector.broadcast %2 : vector<1x32xf32> to vector<64x32xf32>
    %13 = arith.addf %11, %12 : vector<64x32xf32>
    %cst_10 = arith.constant 0.000000e+00 : f32
    %14 = vector.broadcast %cst_10 : f32 to vector<8x32xf32>
    %15 = arith.truncf %14 : vector<8x32xf32> to vector<8x32xbf16>
    %cst_11 = arith.constant dense<0.000000e+00> : vector<8x32xf32>
    %16 = tpu.matmul %15, %8, %cst_11 {dimension_numbers = #tpu.dot_dimension_numbers<[1], [0], [0], [1], [0, 0, 1, 1], [], []>} : vector<8x32xbf16>, vector<32x32xbf16>, vector<8x32xf32> -> vector<8x32xf32>
    %17 = vector.extract_strided_slice %13 {offsets = [0, 0], sizes = [8, 32], strides = [1, 1]} : vector<64x32xf32> to vector<8x32xf32>
    %18 = arith.addf %17, %16 : vector<8x32xf32>
    %19 = math.tanh %18 : vector<8x32xf32>
    %20 = arith.truncf %19 : vector<8x32xf32> to vector<8x32xbf16>
    %cst_12 = arith.constant dense<0.000000e+00> : vector<8x32xf32>
    %21 = tpu.matmul %20, %8, %cst_12 {dimension_numbers = #tpu.dot_dimension_numbers<[1], [0], [0], [1], [0, 0, 1, 1], [], []>} : vector<8x32xbf16>, vector<32x32xbf16>, vector<8x32xf32> -> vector<8x32xf32>
    %22 = vector.extract_strided_slice %13 {offsets = [8, 0], sizes = [8, 32], strides = [1, 1]} : vector<64x32xf32> to vector<8x32xf32>
    %23 = arith.addf %22, %21 : vector<8x32xf32>
    %24 = math.tanh %23 : vector<8x32xf32>
    %25 = arith.truncf %24 : vector<8x32xf32> to vector<8x32xbf16>
    %cst_13 = arith.constant dense<0.000000e+00> : vector<8x32xf32>
    %26 = tpu.matmul %25, %8, %cst_13 {dimension_numbers = #tpu.dot_dimension_numbers<[1], [0], [0], [1], [0, 0, 1, 1], [], []>} : vector<8x32xbf16>, vector<32x32xbf16>, vector<8x32xf32> -> vector<8x32xf32>
    %27 = vector.extract_strided_slice %13 {offsets = [16, 0], sizes = [8, 32], strides = [1, 1]} : vector<64x32xf32> to vector<8x32xf32>
    %28 = arith.addf %27, %26 : vector<8x32xf32>
    %29 = math.tanh %28 : vector<8x32xf32>
    %30 = arith.truncf %29 : vector<8x32xf32> to vector<8x32xbf16>
    %cst_14 = arith.constant dense<0.000000e+00> : vector<8x32xf32>
    %31 = tpu.matmul %30, %8, %cst_14 {dimension_numbers = #tpu.dot_dimension_numbers<[1], [0], [0], [1], [0, 0, 1, 1], [], []>} : vector<8x32xbf16>, vector<32x32xbf16>, vector<8x32xf32> -> vector<8x32xf32>
    %32 = vector.extract_strided_slice %13 {offsets = [24, 0], sizes = [8, 32], strides = [1, 1]} : vector<64x32xf32> to vector<8x32xf32>
    %33 = arith.addf %32, %31 : vector<8x32xf32>
    %34 = math.tanh %33 : vector<8x32xf32>
    %35 = arith.truncf %34 : vector<8x32xf32> to vector<8x32xbf16>
    %cst_15 = arith.constant dense<0.000000e+00> : vector<8x32xf32>
    %36 = tpu.matmul %35, %8, %cst_15 {dimension_numbers = #tpu.dot_dimension_numbers<[1], [0], [0], [1], [0, 0, 1, 1], [], []>} : vector<8x32xbf16>, vector<32x32xbf16>, vector<8x32xf32> -> vector<8x32xf32>
    %37 = vector.extract_strided_slice %13 {offsets = [32, 0], sizes = [8, 32], strides = [1, 1]} : vector<64x32xf32> to vector<8x32xf32>
    %38 = arith.addf %37, %36 : vector<8x32xf32>
    %39 = math.tanh %38 : vector<8x32xf32>
    %40 = arith.truncf %39 : vector<8x32xf32> to vector<8x32xbf16>
    %cst_16 = arith.constant dense<0.000000e+00> : vector<8x32xf32>
    %41 = tpu.matmul %40, %8, %cst_16 {dimension_numbers = #tpu.dot_dimension_numbers<[1], [0], [0], [1], [0, 0, 1, 1], [], []>} : vector<8x32xbf16>, vector<32x32xbf16>, vector<8x32xf32> -> vector<8x32xf32>
    %42 = vector.extract_strided_slice %13 {offsets = [40, 0], sizes = [8, 32], strides = [1, 1]} : vector<64x32xf32> to vector<8x32xf32>
    %43 = arith.addf %42, %41 : vector<8x32xf32>
    %44 = math.tanh %43 : vector<8x32xf32>
    %45 = arith.truncf %44 : vector<8x32xf32> to vector<8x32xbf16>
    %cst_17 = arith.constant dense<0.000000e+00> : vector<8x32xf32>
    %46 = tpu.matmul %45, %8, %cst_17 {dimension_numbers = #tpu.dot_dimension_numbers<[1], [0], [0], [1], [0, 0, 1, 1], [], []>} : vector<8x32xbf16>, vector<32x32xbf16>, vector<8x32xf32> -> vector<8x32xf32>
    %47 = vector.extract_strided_slice %13 {offsets = [48, 0], sizes = [8, 32], strides = [1, 1]} : vector<64x32xf32> to vector<8x32xf32>
    %48 = arith.addf %47, %46 : vector<8x32xf32>
    %49 = math.tanh %48 : vector<8x32xf32>
    %50 = arith.truncf %49 : vector<8x32xf32> to vector<8x32xbf16>
    %cst_18 = arith.constant dense<0.000000e+00> : vector<8x32xf32>
    %51 = tpu.matmul %50, %8, %cst_18 {dimension_numbers = #tpu.dot_dimension_numbers<[1], [0], [0], [1], [0, 0, 1, 1], [], []>} : vector<8x32xbf16>, vector<32x32xbf16>, vector<8x32xf32> -> vector<8x32xf32>
    %52 = vector.extract_strided_slice %13 {offsets = [56, 0], sizes = [8, 32], strides = [1, 1]} : vector<64x32xf32> to vector<8x32xf32>
    %53 = arith.addf %52, %51 : vector<8x32xf32>
    %54 = math.tanh %53 : vector<8x32xf32>
    %cst_19 = arith.constant dense<0.000000e+00> : vector<8x32xf32>
    %55 = tpu.matmul %54, %3, %cst_19 {dimension_numbers = #tpu.dot_dimension_numbers<[1], [0], [0], [1], [0, 0, 1, 1], [], []>} : vector<8x32xf32>, vector<32x32xf32>, vector<8x32xf32> -> vector<8x32xf32>
    %56 = vector.broadcast %4 : vector<1x32xf32> to vector<8x32xf32>
    %57 = arith.addf %55, %56 : vector<8x32xf32>
    %cst_20 = arith.constant 0.000000e+00 : f32
    %58 = vector.broadcast %cst_20 : f32 to vector<8x32xf32>
    %59 = arith.truncf %58 : vector<8x32xf32> to vector<8x32xbf16>
    %cst_21 = arith.constant dense<0.000000e+00> : vector<8x32xf32>
    %60 = tpu.matmul %59, %9, %cst_21 {dimension_numbers = #tpu.dot_dimension_numbers<[1], [0], [0], [1], [0, 0, 1, 1], [], []>} : vector<8x32xbf16>, vector<32x32xbf16>, vector<8x32xf32> -> vector<8x32xf32>
    %61 = arith.addf %57, %60 : vector<8x32xf32>
    %62 = math.tanh %61 : vector<8x32xf32>
    %cst_22 = arith.constant dense<0.000000e+00> : vector<8x16xf32>
    %63 = tpu.matmul %62, %6, %cst_22 {dimension_numbers = #tpu.dot_dimension_numbers<[1], [0], [0], [1], [0, 0, 1, 1], [], []>} : vector<8x32xf32>, vector<32x16xf32>, vector<8x16xf32> -> vector<8x16xf32>
    %64 = arith.truncf %62 : vector<8x32xf32> to vector<8x32xbf16>
    %cst_23 = arith.constant dense<0.000000e+00> : vector<8x32xf32>
    %65 = tpu.matmul %64, %9, %cst_23 {dimension_numbers = #tpu.dot_dimension_numbers<[1], [0], [0], [1], [0, 0, 1, 1], [], []>} : vector<8x32xbf16>, vector<32x32xbf16>, vector<8x32xf32> -> vector<8x32xf32>
    %66 = arith.addf %57, %65 : vector<8x32xf32>
    %67 = math.tanh %66 : vector<8x32xf32>
    %cst_24 = arith.constant dense<0.000000e+00> : vector<8x16xf32>
    %68 = tpu.matmul %67, %6, %cst_24 {dimension_numbers = #tpu.dot_dimension_numbers<[1], [0], [0], [1], [0, 0, 1, 1], [], []>} : vector<8x32xf32>, vector<32x16xf32>, vector<8x16xf32> -> vector<8x16xf32>
    %69 = arith.truncf %67 : vector<8x32xf32> to vector<8x32xbf16>
    %cst_25 = arith.constant dense<0.000000e+00> : vector<8x32xf32>
    %70 = tpu.matmul %69, %9, %cst_25 {dimension_numbers = #tpu.dot_dimension_numbers<[1], [0], [0], [1], [0, 0, 1, 1], [], []>} : vector<8x32xbf16>, vector<32x32xbf16>, vector<8x32xf32> -> vector<8x32xf32>
    %71 = arith.addf %57, %70 : vector<8x32xf32>
    %72 = math.tanh %71 : vector<8x32xf32>
    %cst_26 = arith.constant dense<0.000000e+00> : vector<8x16xf32>
    %73 = tpu.matmul %72, %6, %cst_26 {dimension_numbers = #tpu.dot_dimension_numbers<[1], [0], [0], [1], [0, 0, 1, 1], [], []>} : vector<8x32xf32>, vector<32x16xf32>, vector<8x16xf32> -> vector<8x16xf32>
    %74 = arith.truncf %72 : vector<8x32xf32> to vector<8x32xbf16>
    %cst_27 = arith.constant dense<0.000000e+00> : vector<8x32xf32>
    %75 = tpu.matmul %74, %9, %cst_27 {dimension_numbers = #tpu.dot_dimension_numbers<[1], [0], [0], [1], [0, 0, 1, 1], [], []>} : vector<8x32xbf16>, vector<32x32xbf16>, vector<8x32xf32> -> vector<8x32xf32>
    %76 = arith.addf %57, %75 : vector<8x32xf32>
    %77 = math.tanh %76 : vector<8x32xf32>
    %cst_28 = arith.constant dense<0.000000e+00> : vector<8x16xf32>
    %78 = tpu.matmul %77, %6, %cst_28 {dimension_numbers = #tpu.dot_dimension_numbers<[1], [0], [0], [1], [0, 0, 1, 1], [], []>} : vector<8x32xf32>, vector<32x16xf32>, vector<8x16xf32> -> vector<8x16xf32>
    %79 = arith.truncf %77 : vector<8x32xf32> to vector<8x32xbf16>
    %cst_29 = arith.constant dense<0.000000e+00> : vector<8x32xf32>
    %80 = tpu.matmul %79, %9, %cst_29 {dimension_numbers = #tpu.dot_dimension_numbers<[1], [0], [0], [1], [0, 0, 1, 1], [], []>} : vector<8x32xbf16>, vector<32x32xbf16>, vector<8x32xf32> -> vector<8x32xf32>
    %81 = arith.addf %57, %80 : vector<8x32xf32>
    %82 = math.tanh %81 : vector<8x32xf32>
    %cst_30 = arith.constant dense<0.000000e+00> : vector<8x16xf32>
    %83 = tpu.matmul %82, %6, %cst_30 {dimension_numbers = #tpu.dot_dimension_numbers<[1], [0], [0], [1], [0, 0, 1, 1], [], []>} : vector<8x32xf32>, vector<32x16xf32>, vector<8x16xf32> -> vector<8x16xf32>
    %84 = arith.truncf %82 : vector<8x32xf32> to vector<8x32xbf16>
    %cst_31 = arith.constant dense<0.000000e+00> : vector<8x32xf32>
    %85 = tpu.matmul %84, %9, %cst_31 {dimension_numbers = #tpu.dot_dimension_numbers<[1], [0], [0], [1], [0, 0, 1, 1], [], []>} : vector<8x32xbf16>, vector<32x32xbf16>, vector<8x32xf32> -> vector<8x32xf32>
    %86 = arith.addf %57, %85 : vector<8x32xf32>
    %87 = math.tanh %86 : vector<8x32xf32>
    %cst_32 = arith.constant dense<0.000000e+00> : vector<8x16xf32>
    %88 = tpu.matmul %87, %6, %cst_32 {dimension_numbers = #tpu.dot_dimension_numbers<[1], [0], [0], [1], [0, 0, 1, 1], [], []>} : vector<8x32xf32>, vector<32x16xf32>, vector<8x16xf32> -> vector<8x16xf32>
    %89 = arith.truncf %87 : vector<8x32xf32> to vector<8x32xbf16>
    %cst_33 = arith.constant dense<0.000000e+00> : vector<8x32xf32>
    %90 = tpu.matmul %89, %9, %cst_33 {dimension_numbers = #tpu.dot_dimension_numbers<[1], [0], [0], [1], [0, 0, 1, 1], [], []>} : vector<8x32xbf16>, vector<32x32xbf16>, vector<8x32xf32> -> vector<8x32xf32>
    %91 = arith.addf %57, %90 : vector<8x32xf32>
    %92 = math.tanh %91 : vector<8x32xf32>
    %cst_34 = arith.constant dense<0.000000e+00> : vector<8x16xf32>
    %93 = tpu.matmul %92, %6, %cst_34 {dimension_numbers = #tpu.dot_dimension_numbers<[1], [0], [0], [1], [0, 0, 1, 1], [], []>} : vector<8x32xf32>, vector<32x16xf32>, vector<8x16xf32> -> vector<8x16xf32>
    %94 = arith.truncf %92 : vector<8x32xf32> to vector<8x32xbf16>
    %cst_35 = arith.constant dense<0.000000e+00> : vector<8x32xf32>
    %95 = tpu.matmul %94, %9, %cst_35 {dimension_numbers = #tpu.dot_dimension_numbers<[1], [0], [0], [1], [0, 0, 1, 1], [], []>} : vector<8x32xbf16>, vector<32x32xbf16>, vector<8x32xf32> -> vector<8x32xf32>
    %96 = arith.addf %57, %95 : vector<8x32xf32>
    %97 = math.tanh %96 : vector<8x32xf32>
    %cst_36 = arith.constant dense<0.000000e+00> : vector<8x16xf32>
    %98 = tpu.matmul %97, %6, %cst_36 {dimension_numbers = #tpu.dot_dimension_numbers<[1], [0], [0], [1], [0, 0, 1, 1], [], []>} : vector<8x32xf32>, vector<32x16xf32>, vector<8x16xf32> -> vector<8x16xf32>
    %99 = tpu.concatenate %63, %68, %73, %78, %83, %88, %93, %98 in 1 : vector<8x16xf32>, vector<8x16xf32>, vector<8x16xf32>, vector<8x16xf32>, vector<8x16xf32>, vector<8x16xf32>, vector<8x16xf32>, vector<8x16xf32> -> vector<8x128xf32>
    %100 = vector.broadcast %7 : vector<1x128xf32> to vector<8x128xf32>
    %101 = arith.addf %99, %100 : vector<8x128xf32>
    %c0_37 = arith.constant 0 : index
    %c0_38 = arith.constant 0 : index
    %102 = vector.load %arg2[%c0_37, %c0_38] : memref<8x128xf32, #tpu.memory_space<vmem>>, vector<8x128xf32>
    tpu.vector_store %arg2[%c0_37, %c0_38], %101 {strides = array<i32>} : memref<8x128xf32, #tpu.memory_space<vmem>>, vector<8x128xf32>,
    return
  }
}

</mosaic_0001>

<bundles_post_ra>
// kernel: autoencoder_forward.1
= control target key start
LH: loop header
LB: loop body
LE: loop exit
PB: predicated region body
PF: predicated region fallthrough
CT: control target
= control target key end

     0   :  { %7 = vsyncpa [#allocation3], 0  ;;  %s2084_s9 = smov [#allocation2]   ;;  %s2401_s0 = inlined_call_operand.vmem [shape: f32[64,16], index: 0, kind: input, shape index: {}]   ;;  %s2402_s1 = inlined_call_operand.hbm [shape: f32[168,128], index: 1, kind: input, shape index: {}]   ;;  %s2403_s2 = inlined_call_operand.vmem [shape: f32[8,128], index: 2, kind: output, shape index: {}]  }
   0x1   :  { %s15_s10 = sshll.u32 %s2084_s9, 4  ;;  %s16_s10 = int_to_ptr.vmem [resolvable:$true] %s15_s10 }
   0x2   :  { %s2070_s11 = scalar_lea.vmem %s16_s10, 2688  ;;  %p2075_p1 = scmp.lt.s32.totalorder %s16_s10, %s16_s10 }
   0x3   :  { %p2071_p0 = scmp.ne.s32.totalorder %s16_s10, %s2070_s11  ;;  %p2076_p2 = scmp.lt.s32.totalorder %s2070_s11, %s2070_s11 }
   0x5   :  { %p2077_p3 = por %p2076_p2, %p2075_p1 }
   0x7   :  { %p2078_p4 = pnand %p2077_p3, %p2071_p0 }
   0x9   :  { %2081 = shalt.err (!%p2078_p4)
}
   0xa   :  { %s2085_s12 = smov 128   ;;  %s2086_s13 = smov 8  }
   0xb   :  { %21 = dma.hbm_to_vmem [thread:$0]  %s2402_s1, 2688, %s16_s10, [#allocation3], %s2085_s12, %s2085_s12, %s2086_s13  }
   0xc   :  { %2082 = dma.done.wait [#allocation3], 2688  }
   0xd   :  { %2083 = vsyncadd [#allocation3], 4294964608  ;;  %v2087_v0 = vmov 0.0   ;;  %vm2088_vm0 = vmmov 0   ;;  %vm63_vm1 = vcmask 130048   ;;  %v27_v1 = vld [vmem:[#allocation2 + $0x8] sm:$0xff] }
   0xe   :  { %1790 = vmatprep.subr.bf16.mxu1 %v2087_v0  ;;  %1794 = vmatprep.mubr.msk.bf16.mxu1 %vm2088_vm0, %v2087_v0  ;;  %v26_v2 = vld [vmem:[#allocation2] sm:$0xff]  ;;  %v31_v4 = vld [vmem:[#allocation2 + $0x28] sm:$0xff]  ;;  %v28_v8 = vld [vmem:[#allocation2 + $0x10] sm:$0xff]  ;;  %v2089_v11 = vmov 0   ;;  %vm193_vm2 = vcmask 261120   ;;  %s2091_s3 = smov 32  }
   0xf   :  { %v30_v3 = vld [vmem:[#allocation2 + $0x20] sm:$0xff]  ;;  %1774 = vmatprep.subr.mxu0 %v27_v1  ;;  %v52_v7 = vld [vmem:[%s2401_s0 + $0x8] sm:$0xff]  ;;  %v29_v9 = vld [vmem:[#allocation2 + $0x18] sm:$0xff]  ;;  %s2092_s4 = smov 48   ;;  %s2093_s5 = smov 64   ;;  %vm1616_vm3 = vcmask 392192  }
  0x10   :  { %v51_v5 = vld [vmem:[%s2401_s0] sm:$0xff]  ;;  %1775 = vmatpush3.msra.mxu0 %v27_v1  ;;  %v2121_v6 = vpack.c.bf16 %v31_v4, %v30_v3  ;;  %v2128_v10 = vpack.c.bf16 %v29_v9, %v28_v8  ;;  %v2146_v13 = vld [vmem:[#allocation2 + $0x30] ss:$0 sm:$0xff]  ;;  %v54_v24 = vld [vmem:[%s2401_s0 + $0x18] sm:$0xff]  ;;  %s2094_s6 = smov 80   ;;  %s2095_s7 = smov 96  }
  0x11   :  { %1778 = vmatprep.mubr.msk.f32.mxu0 %vm63_vm1, %v51_v5  ;;  %1776 = vmatprep.subr.mxu0 %v26_v2  ;;  %v53_v23 = vld [vmem:[%s2401_s0 + $0x10] sm:$0xff]  ;;  %v55_v25 = vld [vmem:[%s2401_s0 + $0x20] sm:$0xff]  ;;  %v56_v26 = vld [vmem:[%s2401_s0 + $0x28] sm:$0xff]  ;;  %s2096_s8 = smov 112   ;;  %vm1618_vm4 = vcmask 523264   ;;  %vm1620_vm5 = vcmask 654336  }
  0x12   :  { %1791 = vmatpush3.bf16.msra.mxu1 %v2121_v6  ;;  %1777 = vmatpush3.msra.mxu0 %v26_v2  ;;  %v57_v27 = vld [vmem:[%s2401_s0 + $0x30] sm:$0xff]  ;;  %v58_v28 = vld [vmem:[%s2401_s0 + $0x38] sm:$0xff]  ;;  %s2090_s0 = smov 16   ;;  %vm1622_vm6 = vcmask 785408   ;;  %vm1624_vm7 = vcmask 916480  }
  0x13   :  { %1779 = vmatmul.mubr.msk.f32.vlgmr.msra.gmra.mxu0 %vm63_vm1, %v52_v7  ;;  %1792 = vmatprep.subr.bf16.mxu1 %v2087_v0 }
  0x14   :  { %1806 = vmatprep.subr.bf16.mxu0 %v2087_v0  ;;  %1781 = vmatprep.mubr.msk.f32.mxu0 %vm63_vm1, %v53_v23  ;;  %v41_v23 = vld [vmem:[#allocation2 + $0x78] sm:$0xff] }
  0x15   :  { %1807 = vmatpush3.bf16.msra.mxu0 %v2121_v6 }
  0x16   :  { %1793 = vmatpush3.bf16.msra.mxu1 %v2128_v10  ;;  %1808 = vmatprep.subr.bf16.mxu0 %v2087_v0 }
  0x17   :  { %1798 = vmatprep.subr.bf16.mxu1 %v2087_v0  ;;  %1782 = vmatmul.mubr.msk.f32.gmra.mxu0 %vm63_vm1, %v54_v24 }
  0x18   :  { %1784 = vmatprep.mubr.msk.f32.mxu0 %vm63_vm1, %v55_v25  ;;  %v36_v25 = vld [vmem:[#allocation2 + $0x50] sm:$0xff] }
  0x19   :  { %1795 = vmatmul.mubr.bf16.vlgmr.msra.gmra.mxu1 %v2089_v11  ;;  %1809 = vmatpush3.bf16.msra.mxu0 %v2128_v10 }
  0x1a   :  { %1799 = vmatpush3.bf16.msra.mxu1 %v2121_v6  ;;  %1802 = vmatprep.mubr.msk.bf16.mxu1 %vm2088_vm0, %v2087_v0 }
  0x1b   :  { %1800 = vmatprep.subr.bf16.mxu1 %v2087_v0  ;;  %1822 = vmatprep.subr.bf16.mxu0 %v2087_v0 }
  0x1c   :  { %1785 = vmatmul.mubr.msk.f32.gmra.mxu0 %vm63_vm1, %v56_v26  ;;  %v38_v26 = vld [vmem:[#allocation2 + $0x60] sm:$0xff] }
  0x1d   :  { %1787 = vmatprep.mubr.msk.f32.mxu0 %vm63_vm1, %v57_v27  ;;  %v39_v27 = vld [vmem:[#allocation2 + $0x68] sm:$0xff] }
  0x1e   :  { %1801 = vmatpush3.bf16.msra.mxu1 %v2128_v10 }
  0x1f   :  { %1814 = vmatprep.subr.bf16.mxu1 %v2087_v0 }
  0x20   :  { %1788 = vmatmul.mubr.msk.f32.gmra.mxu0 %vm63_vm1, %v58_v28  ;;  %v2228_v28 = vpack.c.bf16 %v39_v27, %v38_v26 }
  0x21   :  { %1810 = vmatprep.mubr.msk.bf16.mxu0 %vm2088_vm0, %v2087_v0 }
  0xd3   :  { %v1780_v12 = vpop.f32.mrf.mxu0 }
  0xd4   :  { %v160_v29 = vadd.f32 %v1780_v12, %v2146_v13 }
  0xd5   :  { %v154_v14 = vpop.f32.mrf.mxu0 }
  0xd6   :  { %v155_v15 = vadd.f32 %v2146_v13, %v154_v14 }
  0xd7   :  { %v1783_v37 = vpop.f32.mrf.mxu0 }
  0xd8   :  { %v170_v51 = vadd.f32 %v1783_v37, %v2146_v13 }
  0xd9   :  { %v231_v16 = vpop.f32.mrf.mxu1  ;;  %v164_v38 = vpop.f32.mrf.mxu0 }
  0xda   :  { %v237_v17 = vadd.f32 %v231_v16, %v155_v15  ;;  %v165_v43 = vadd.f32 %v2146_v13, %v164_v38 }
  0xdb   :  { %v1796_v18 = vpop.f32.mrf.mxu1 }
  0xdc   :  { %2030 = vtanh.f32 %v237_v17  ;;  %v1786_v39 = vpop.f32.mrf.mxu0 }
  0xdd   :  { %v234_v19 = vpop.f32.mrf.mxu1  ;;  %v180_v4 = vadd.f32 %v1786_v39, %v2146_v13 }
  0xde   :  { %v174_v40 = vpop.f32.mrf.mxu0 }
  0xdf   :  { %v1797_v20 = vpop.f32.mrf.mxu1  ;;  %v175_v59 = vadd.f32 %v2146_v13, %v174_v40 }
  0xe0   :  { %v2190_v41 = vpop.f32.mrf.mxu0 }
  0xe2   :  { %v184_v42 = vpop.f32.mrf.mxu0 }
  0xe9   :  { %v2031_v21 = vpop.eup %2030 }
  0xea   :  { %v239_v22 = vpack.c.bf16 %v2031_v21, %v2031_v21 }
  0xec   :  { %1803 = vmatmul.mubr.msk.bf16.vlgmr.msra.gmra.mxu1 %vm193_vm2, %v239_v22  ;;  %v40_v22 = vld [vmem:[#allocation2 + $0x70] sm:$0xff] }
  0xed   :  { %1815 = vmatpush3.bf16.msra.mxu1 %v2121_v6  ;;  %1818 = vmatprep.mubr.msk.bf16.mxu1 %vm2088_vm0, %v2087_v0  ;;  %v2224_v24 = vpack.c.bf16 %v41_v23, %v40_v22 }
  0xee   :  { %1816 = vmatprep.subr.bf16.mxu1 %v2087_v0 }
  0xf1   :  { %1817 = vmatpush3.bf16.msra.mxu1 %v2128_v10 }
  0xf2   :  { %1830 = vmatprep.subr.bf16.mxu1 %v2087_v0 }
 0x1ac   :  { %v277_v30 = vpop.f32.mrf.mxu1 }
 0x1ad   :  { %v283_v31 = vadd.f32 %v277_v30, %v160_v29  ;;  %v35_v29 = vld [vmem:[#allocation2 + $0x48] sm:$0xff]  ;;  %v34_v30 = vld [vmem:[#allocation2 + $0x40] sm:$0xff] }
 0x1ae   :  { %v1804_v32 = vpop.f32.mrf.mxu1 }
 0x1af   :  { %2032 = vtanh.f32 %v283_v31  ;;  %v33_v31 = vld [vmem:[#allocation2 + $0x38] sm:$0xff]  ;;  %v190_v32 = vadd.f32 %v2190_v41, %v2146_v13  ;;  %v2258_v41 = vld [vmem:[#allocation2 + $0x80] sm:$0xff] }
 0x1b0   :  { %v280_v33 = vpop.f32.mrf.mxu1 }
 0x1b2   :  { %v1805_v34 = vpop.f32.mrf.mxu1 }
 0x1bc   :  { %v2033_v35 = vpop.eup %2032 }
 0x1bd   :  { %v285_v36 = vpack.c.bf16 %v2033_v35, %v2033_v35 }
 0x1bf   :  { %1811 = vmatmul.mubr.msk.bf16.vlgmr.msra.gmra.mxu0 %vm193_vm2, %v285_v36 }
 0x1c0   :  { %1823 = vmatpush3.bf16.msra.mxu0 %v2121_v6  ;;  %1826 = vmatprep.mubr.msk.bf16.mxu0 %vm2088_vm0, %v2087_v0 }
 0x1c1   :  { %1824 = vmatprep.subr.bf16.mxu0 %v2087_v0 }
 0x1c4   :  { %1825 = vmatpush3.bf16.msra.mxu0 %v2128_v10 }
 0x1c5   :  { %1838 = vmatprep.subr.bf16.mxu0 %v2087_v0 }
 0x27f   :  { %v323_v44 = vpop.f32.mrf.mxu0 }
 0x280   :  { %v329_v45 = vadd.f32 %v323_v44, %v165_v43  ;;  %v2248_v43 = vld [vmem:[#allocation2 + $0x98] sm:$0xff]  ;;  %v2250_v44 = vld [vmem:[#allocation2 + $0x90] sm:$0xff] }
 0x281   :  { %v1812_v46 = vpop.f32.mrf.mxu0 }
 0x282   :  { %2034 = vtanh.f32 %v329_v45  ;;  %v1653_v45 = vld [vmem:[#allocation2 + $0x58] ss:$0 sm:$0xff] }
 0x283   :  { %v326_v47 = vpop.f32.mrf.mxu0 }
 0x285   :  { %v1813_v48 = vpop.f32.mrf.mxu0 }
 0x28f   :  { %v2035_v49 = vpop.eup %2034 }
 0x290   :  { %v331_v50 = vpack.c.bf16 %v2035_v49, %v2035_v49 }
 0x292   :  { %1819 = vmatmul.mubr.msk.bf16.vlgmr.msra.gmra.mxu1 %vm193_vm2, %v331_v50 }
 0x293   :  { %1831 = vmatpush3.bf16.msra.mxu1 %v2121_v6  ;;  %1834 = vmatprep.mubr.msk.bf16.mxu1 %vm2088_vm0, %v2087_v0 }
 0x294   :  { %1832 = vmatprep.subr.bf16.mxu1 %v2087_v0 }
 0x297   :  { %1833 = vmatpush3.bf16.msra.mxu1 %v2128_v10 }
 0x298   :  { %1846 = vmatprep.subr.bf16.mxu1 %v2087_v0 }
 0x352   :  { %v369_v52 = vpop.f32.mrf.mxu1 }
 0x353   :  { %v375_v53 = vadd.f32 %v369_v52, %v170_v51 }
 0x354   :  { %v1820_v54 = vpop.f32.mrf.mxu1 }
 0x355   :  { %2036 = vtanh.f32 %v375_v53 }
 0x356   :  { %v372_v55 = vpop.f32.mrf.mxu1 }
 0x358   :  { %v1821_v56 = vpop.f32.mrf.mxu1 }
 0x362   :  { %v2037_v57 = vpop.eup %2036 }
 0x363   :  { %v377_v58 = vpack.c.bf16 %v2037_v57, %v2037_v57 }
 0x365   :  { %1827 = vmatmul.mubr.msk.bf16.vlgmr.msra.gmra.mxu0 %vm193_vm2, %v377_v58 }
 0x366   :  { %1839 = vmatpush3.bf16.msra.mxu0 %v2121_v6  ;;  %1842 = vmatprep.mubr.msk.bf16.mxu0 %vm2088_vm0, %v2087_v0 }
 0x367   :  { %1840 = vmatprep.subr.bf16.mxu0 %v2087_v0 }
 0x36a   :  { %1841 = vmatpush3.bf16.msra.mxu0 %v2128_v10 }
 0x36b   :  { %1854 = vmatprep.subr.mxu0 %v2087_v0 }
 0x425   :  { %v415_v60 = vpop.f32.mrf.mxu0 }
 0x426   :  { %v421_v61 = vadd.f32 %v415_v60, %v175_v59 }
 0x427   :  { %v1828_v62 = vpop.f32.mrf.mxu0 }
 0x428   :  { %2038 = vtanh.f32 %v421_v61 }
 0x429   :  { %v418_v63 = vpop.f32.mrf.mxu0 }
 0x42b   :  { %v1829_v1 = vpop.f32.mrf.mxu0 }
 0x435   :  { %v2039_v2 = vpop.eup %2038 }
 0x436   :  { %v423_v3 = vpack.c.bf16 %v2039_v2, %v2039_v2 }
 0x438   :  { %1835 = vmatmul.mubr.msk.bf16.vlgmr.msra.gmra.mxu1 %vm193_vm2, %v423_v3 }
 0x439   :  { %1847 = vmatpush3.bf16.msra.mxu1 %v2121_v6  ;;  %1850 = vmatprep.mubr.msk.bf16.mxu1 %vm2088_vm0, %v2087_v0  ;;  %v185_v6 = vadd.f32 %v2146_v13, %v184_v42  ;;  %v2254_v13 = vld [vmem:[#allocation2 + $0x88] sm:$0xff] }
 0x43a   :  { %1848 = vmatprep.subr.bf16.mxu1 %v2087_v0 }
 0x43d   :  { %1849 = vmatpush3.bf16.msra.mxu1 %v2128_v10 }
 0x43e   :  { %1865 = vmatprep.subr.bf16.mxu1 %v2087_v0 }
 0x4f8   :  { %v461_v5 = vpop.f32.mrf.mxu1 }
 0x4f9   :  { %v467_v7 = vadd.f32 %v461_v5, %v180_v4 }
 0x4fa   :  { %v1836_v8 = vpop.f32.mrf.mxu1 }
 0x4fb   :  { %2040 = vtanh.f32 %v467_v7 }
 0x4fc   :  { %v464_v9 = vpop.f32.mrf.mxu1 }
 0x4fe   :  { %v1837_v12 = vpop.f32.mrf.mxu1 }
 0x508   :  { %v2041_v14 = vpop.eup %2040 }
 0x509   :  { %v469_v15 = vpack.c.bf16 %v2041_v14, %v2041_v14 }
 0x50b   :  { %1843 = vmatmul.mubr.msk.bf16.vlgmr.msra.gmra.mxu0 %vm193_vm2, %v469_v15 }
 0x50c   :  { %1862 = vmatprep.mubr.msk.f32.mxu0 %vm2088_vm0, %v2087_v0  ;;  %1855 = vmatpush3.msra.mxu0 %v36_v25 }
 0x50d   :  { %1856 = vmatprep.subr.mxu0 %v2087_v0 }
 0x50e   :  { %1857 = vmatpush3.msra.mxu0 %v35_v29 }
 0x50f   :  { %1858 = vmatprep.subr.mxu0 %v2087_v0 }
 0x510   :  { %1859 = vmatpush3.msra.mxu0 %v34_v30 }
 0x511   :  { %1860 = vmatprep.subr.mxu0 %v2087_v0 }
 0x512   :  { %1861 = vmatpush3.msra.mxu0 %v33_v31 }
 0x513   :  { %1873 = vmatprep.subr.mxu0 %v2087_v0 }
 0x5cb   :  { %v507_v10 = vpop.f32.mrf.mxu0 }
 0x5cc   :  { %v513_v16 = vadd.f32 %v507_v10, %v185_v6 }
 0x5cd   :  { %v1844_v17 = vpop.f32.mrf.mxu0 }
 0x5ce   :  { %2042 = vtanh.f32 %v513_v16 }
 0x5cf   :  { %v510_v18 = vpop.f32.mrf.mxu0 }
 0x5d1   :  { %v1845_v19 = vpop.f32.mrf.mxu0 }
 0x5db   :  { %v2043_v20 = vpop.eup %2042 }
 0x5dc   :  { %v515_v21 = vpack.c.bf16 %v2043_v20, %v2043_v20 }
 0x5de   :  { %1851 = vmatmul.mubr.msk.bf16.vlgmr.msra.gmra.mxu1 %vm193_vm2, %v515_v21 }
 0x5df   :  { %1869 = vmatprep.mubr.msk.bf16.mxu1 %vm2088_vm0, %v2087_v0  ;;  %1866 = vmatpush3.bf16.msra.mxu1 %v2224_v24 }
 0x5e0   :  { %1867 = vmatprep.subr.bf16.mxu1 %v2087_v0 }
 0x5e3   :  { %1868 = vmatpush3.bf16.msra.mxu1 %v2228_v28 }
 0x5e4   :  { %1884 = vmatprep.subr.bf16.mxu1 %v2087_v0 }
 0x5e6   :  { %1870 = vmatmul.mubr.bf16.vlgmr.msra.gmra.mxu1 %v2089_v11 }
 0x5e7   :  { %1885 = vmatpush3.bf16.msra.mxu1 %v2224_v24  ;;  %1888 = vmatprep.mubr.msk.bf16.mxu1 %vm2088_vm0, %v2087_v0 }
 0x5e8   :  { %1886 = vmatprep.subr.bf16.mxu1 %v2087_v0 }
 0x5eb   :  { %1887 = vmatpush3.bf16.msra.mxu1 %v2228_v28 }
 0x5ec   :  { %1903 = vmatprep.subr.bf16.mxu1 %v2087_v0 }
 0x69e   :  { %v553_v33 = vpop.f32.mrf.mxu1 }
 0x69f   :  { %v559_v34 = vadd.f32 %v553_v33, %v190_v32 }
 0x6a0   :  { %v1852_v11 = vpop.f32.mrf.mxu1 }
 0x6a1   :  { %2044 = vtanh.f32 %v559_v34 }
 0x6a2   :  { %v556_v35 = vpop.f32.mrf.mxu1 }
 0x6a4   :  { %v1853_v36 = vpop.f32.mrf.mxu1 }
 0x6a6   :  { %v672_v38 = vpop.f32.mrf.mxu1 }
 0x6a8   :  { %v1871_v39 = vpop.f32.mrf.mxu1 }
 0x6aa   :  { %v675_v40 = vpop.f32.mrf.mxu1 }
 0x6ac   :  { %v1872_v42 = vpop.f32.mrf.mxu1 }
 0x6ae   :  { %v2045_v37 = vpop.eup %2044 }
 0x6af   :  { %1863 = vmatmul.mubr.msk.f32.vlgmr.msra.gmra.mxu0 %vm193_vm2, %v2045_v37 }
 0x6b0   :  { %1881 = vmatprep.mubr.msk.f32.mxu0 %vm2088_vm0, %v2087_v0  ;;  %1874 = vmatpush3.msra.mxu0 %v2248_v43 }
 0x6b1   :  { %1875 = vmatprep.subr.mxu0 %v2087_v0 }
 0x6b2   :  { %1876 = vmatpush3.msra.mxu0 %v2250_v44 }
 0x6b3   :  { %1877 = vmatprep.subr.mxu0 %v2087_v0 }
 0x6b4   :  { %1878 = vmatpush3.msra.mxu0 %v2254_v13 }
 0x6b5   :  { %1879 = vmatprep.subr.mxu0 %v2087_v0 }
 0x6b6   :  { %1880 = vmatpush3.msra.mxu0 %v2258_v41 }
 0x6b7   :  { %1892 = vmatprep.subr.mxu0 %v2087_v0 }
 0x76f   :  { %v634_v46 = vpop.f32.mrf.mxu0 }
 0x770   :  { %v2264_v47 = vadd.f32 %v1653_v45, %v634_v46 }
 0x771   :  { %v1864_v48 = vpop.f32.mrf.mxu0 }
 0x772   :  { %v678_v49 = vadd.f32 %v672_v38, %v2264_v47 }
 0x774   :  { %2046 = vtanh.f32 %v678_v49 }
 0x781   :  { %v2047_v50 = vpop.eup %2046 }
 0x782   :  { %1882 = vmatmul.mubr.msk.f32.vlgmr.msra.gmra.mxu0 %vm193_vm2, %v2047_v50  ;;  %v753_v51 = vpack.c.bf16 %v2047_v50, %v2047_v50 }
 0x783   :  { %1893 = vmatpush3.msra.mxu0 %v2248_v43  ;;  %1900 = vmatprep.mubr.msk.f32.mxu0 %vm2088_vm0, %v2087_v0 }
 0x784   :  { %1889 = vmatmul.mubr.msk.bf16.vlgmr.msra.gmra.mxu1 %vm193_vm2, %v753_v51  ;;  %1894 = vmatprep.subr.mxu0 %v2087_v0 }
 0x785   :  { %1904 = vmatpush3.bf16.msra.mxu1 %v2224_v24  ;;  %1895 = vmatpush3.msra.mxu0 %v2250_v44 }
 0x786   :  { %1896 = vmatprep.subr.mxu0 %v2087_v0  ;;  %1905 = vmatprep.subr.bf16.mxu1 %v2087_v0 }
 0x787   :  { %1897 = vmatpush3.msra.mxu0 %v2254_v13  ;;  %1907 = vmatprep.mubr.msk.bf16.mxu1 %vm2088_vm0, %v2087_v0 }
 0x788   :  { %1898 = vmatprep.subr.mxu0 %v2087_v0 }
 0x789   :  { %1906 = vmatpush3.bf16.msra.mxu1 %v2228_v28  ;;  %1899 = vmatpush3.msra.mxu0 %v2258_v41 }
 0x78a   :  { %1911 = vmatprep.subr.mxu0 %v2087_v0  ;;  %1922 = vmatprep.subr.bf16.mxu1 %v2087_v0 }
 0x842   :  { %v2285_v52 = vpop.f32.mrf.mxu0 }
 0x844   :  { %v1883_v53 = vpop.f32.mrf.mxu0  ;;  %v791_v54 = vpop.f32.mrf.mxu1 }
 0x845   :  { %v797_v55 = vadd.f32 %v791_v54, %v2264_v47 }
 0x846   :  { %v1890_v56 = vpop.f32.mrf.mxu1 }
 0x847   :  { %2048 = vtanh.f32 %v797_v55 }
 0x848   :  { %v794_v57 = vpop.f32.mrf.mxu1 }
 0x84a   :  { %v1891_v58 = vpop.f32.mrf.mxu1 }
 0x854   :  { %v2049_v59 = vpop.eup %2048 }
 0x855   :  { %1901 = vmatmul.mubr.msk.f32.vlgmr.msra.gmra.mxu0 %vm193_vm2, %v2049_v59  ;;  %v872_v60 = vpack.c.bf16 %v2049_v59, %v2049_v59 }
 0x856   :  { %1912 = vmatpush3.msra.mxu0 %v2248_v43  ;;  %1919 = vmatprep.mubr.msk.f32.mxu0 %vm2088_vm0, %v2087_v0 }
 0x857   :  { %1908 = vmatmul.mubr.msk.bf16.vlgmr.msra.gmra.mxu1 %vm193_vm2, %v872_v60  ;;  %1913 = vmatprep.subr.mxu0 %v2087_v0 }
 0x858   :  { %1923 = vmatpush3.bf16.msra.mxu1 %v2224_v24  ;;  %1914 = vmatpush3.msra.mxu0 %v2250_v44 }
 0x859   :  { %1915 = vmatprep.subr.mxu0 %v2087_v0  ;;  %1924 = vmatprep.subr.bf16.mxu1 %v2087_v0 }
 0x85a   :  { %1916 = vmatpush3.msra.mxu0 %v2254_v13  ;;  %1926 = vmatprep.mubr.msk.bf16.mxu1 %vm2088_vm0, %v2087_v0 }
 0x85b   :  { %1917 = vmatprep.subr.mxu0 %v2087_v0 }
 0x85c   :  { %1925 = vmatpush3.bf16.msra.mxu1 %v2228_v28  ;;  %1918 = vmatpush3.msra.mxu0 %v2258_v41 }
 0x85d   :  { %1930 = vmatprep.subr.mxu0 %v2087_v0  ;;  %1941 = vmatprep.subr.bf16.mxu1 %v2087_v0 }
 0x915   :  { %v868_v61 = vpop.f32.mrf.mxu0 }
 0x916   :  { %1587 = vrot.lane.b32.xlu0 %v868_v61, %s2090_s0 }
 0x917   :  { %v1902_v62 = vpop.f32.mrf.mxu0  ;;  %v910_v63 = vpop.f32.mrf.mxu1 }
 0x918   :  { %v916_v1 = vadd.f32 %v910_v63, %v2264_v47 }
 0x919   :  { %v1909_v2 = vpop.f32.mrf.mxu1 }
 0x91a   :  { %2050 = vtanh.f32 %v916_v1  ;;  %v1670_v1 = vld [vmem:[#allocation2 + $0xa0] ss:$0 sm:$0xff] }
 0x91b   :  { %v913_v3 = vpop.f32.mrf.mxu1 }
 0x91d   :  { %v1910_v4 = vpop.f32.mrf.mxu1 }
 0x927   :  { %v2051_v5 = vpop.eup %2050 }
 0x928   :  { %1920 = vmatmul.mubr.msk.f32.vlgmr.msra.gmra.mxu0 %vm193_vm2, %v2051_v5  ;;  %v991_v7 = vpack.c.bf16 %v2051_v5, %v2051_v5 }
 0x929   :  { %1931 = vmatpush3.msra.mxu0 %v2248_v43  ;;  %1938 = vmatprep.mubr.msk.f32.mxu0 %vm2088_vm0, %v2087_v0 }
 0x92a   :  { %1927 = vmatmul.mubr.msk.bf16.vlgmr.msra.gmra.mxu1 %vm193_vm2, %v991_v7  ;;  %1932 = vmatprep.subr.mxu0 %v2087_v0 }
 0x92b   :  { %1942 = vmatpush3.bf16.msra.mxu1 %v2224_v24  ;;  %1933 = vmatpush3.msra.mxu0 %v2250_v44 }
 0x92c   :  { %1934 = vmatprep.subr.mxu0 %v2087_v0  ;;  %1943 = vmatprep.subr.bf16.mxu1 %v2087_v0 }
 0x92d   :  { %1935 = vmatpush3.msra.mxu0 %v2254_v13  ;;  %1945 = vmatprep.mubr.msk.bf16.mxu1 %vm2088_vm0, %v2087_v0 }
 0x92e   :  { %1936 = vmatprep.subr.mxu0 %v2087_v0 }
 0x92f   :  { %1944 = vmatpush3.bf16.msra.mxu1 %v2228_v28  ;;  %1937 = vmatpush3.msra.mxu0 %v2258_v41 }
 0x930   :  { %1949 = vmatprep.subr.mxu0 %v2087_v0  ;;  %1960 = vmatprep.subr.bf16.mxu1 %v2087_v0 }
 0x9e8   :  { %v987_v8 = vpop.f32.mrf.mxu0 }
 0x9e9   :  { %1591 = vrot.lane.b32.xlu0 %v987_v8, %s2091_s3 }
 0x9ea   :  { %v1921_v9 = vpop.f32.mrf.mxu0  ;;  %v1029_v12 = vpop.f32.mrf.mxu1 }
 0x9eb   :  { %v1035_v14 = vadd.f32 %v1029_v12, %v2264_v47 }
 0x9ec   :  { %v1928_v15 = vpop.f32.mrf.mxu1 }
 0x9ed   :  { %2052 = vtanh.f32 %v1035_v14 }
 0x9ee   :  { %v1032_v6 = vpop.f32.mrf.mxu1 }
 0x9f0   :  { %v1929_v10 = vpop.f32.mrf.mxu1 }
 0x9fa   :  { %v2053_v16 = vpop.eup %2052 }
 0x9fb   :  { %1939 = vmatmul.mubr.msk.f32.vlgmr.msra.gmra.mxu0 %vm193_vm2, %v2053_v16  ;;  %v1110_v17 = vpack.c.bf16 %v2053_v16, %v2053_v16 }
 0x9fc   :  { %1950 = vmatpush3.msra.mxu0 %v2248_v43  ;;  %1957 = vmatprep.mubr.msk.f32.mxu0 %vm2088_vm0, %v2087_v0 }
 0x9fd   :  { %1946 = vmatmul.mubr.msk.bf16.vlgmr.msra.gmra.mxu1 %vm193_vm2, %v1110_v17  ;;  %1951 = vmatprep.subr.mxu0 %v2087_v0 }
 0x9fe   :  { %1961 = vmatpush3.bf16.msra.mxu1 %v2224_v24  ;;  %1952 = vmatpush3.msra.mxu0 %v2250_v44 }
 0x9ff   :  { %1953 = vmatprep.subr.mxu0 %v2087_v0  ;;  %1962 = vmatprep.subr.bf16.mxu1 %v2087_v0 }
 0xa00   :  { %1954 = vmatpush3.msra.mxu0 %v2254_v13  ;;  %1964 = vmatprep.mubr.msk.bf16.mxu1 %vm2088_vm0, %v2087_v0 }
 0xa01   :  { %1955 = vmatprep.subr.mxu0 %v2087_v0 }
 0xa02   :  { %1963 = vmatpush3.bf16.msra.mxu1 %v2228_v28  ;;  %1956 = vmatpush3.msra.mxu0 %v2258_v41 }
 0xa03   :  { %1968 = vmatprep.subr.mxu0 %v2087_v0  ;;  %1979 = vmatprep.subr.bf16.mxu1 %v2087_v0 }
 0xabb   :  { %v1106_v18 = vpop.f32.mrf.mxu0 }
 0xabc   :  { %1595 = vrot.lane.b32.xlu1 %v1106_v18, %s2092_s4 }
 0xabd   :  { %v1940_v19 = vpop.f32.mrf.mxu0  ;;  %v1148_v20 = vpop.f32.mrf.mxu1 }
 0xabe   :  { %v1154_v21 = vadd.f32 %v1148_v20, %v2264_v47 }
 0xabf   :  { %v1947_v22 = vpop.f32.mrf.mxu1 }
 0xac0   :  { %2054 = vtanh.f32 %v1154_v21 }
 0xac1   :  { %v1151_v23 = vpop.f32.mrf.mxu1 }
 0xac3   :  { %v1948_v25 = vpop.f32.mrf.mxu1 }
 0xacd   :  { %v2055_v26 = vpop.eup %2054 }
 0xace   :  { %1958 = vmatmul.mubr.msk.f32.vlgmr.msra.gmra.mxu0 %vm193_vm2, %v2055_v26  ;;  %v1229_v27 = vpack.c.bf16 %v2055_v26, %v2055_v26 }
 0xacf   :  { %1969 = vmatpush3.msra.mxu0 %v2248_v43  ;;  %1976 = vmatprep.mubr.msk.f32.mxu0 %vm2088_vm0, %v2087_v0 }
 0xad0   :  { %1965 = vmatmul.mubr.msk.bf16.vlgmr.msra.gmra.mxu1 %vm193_vm2, %v1229_v27  ;;  %1970 = vmatprep.subr.mxu0 %v2087_v0 }
 0xad1   :  { %1980 = vmatpush3.bf16.msra.mxu1 %v2224_v24  ;;  %1971 = vmatpush3.msra.mxu0 %v2250_v44 }
 0xad2   :  { %1972 = vmatprep.subr.mxu0 %v2087_v0  ;;  %1981 = vmatprep.subr.bf16.mxu1 %v2087_v0 }
 0xad3   :  { %1973 = vmatpush3.msra.mxu0 %v2254_v13  ;;  %1983 = vmatprep.mubr.msk.bf16.mxu1 %vm2088_vm0, %v2087_v0 }
 0xad4   :  { %1974 = vmatprep.subr.mxu0 %v2087_v0 }
 0xad5   :  { %1982 = vmatpush3.bf16.msra.mxu1 %v2228_v28  ;;  %1975 = vmatpush3.msra.mxu0 %v2258_v41 }
 0xad6   :  { %1987 = vmatprep.subr.mxu0 %v2087_v0  ;;  %1998 = vmatprep.subr.bf16.mxu1 %v2087_v0 }
 0xb8e   :  { %v1225_v29 = vpop.f32.mrf.mxu0 }
 0xb8f   :  { %1599 = vrot.lane.b32.xlu1 %v1225_v29, %s2093_s5 }
 0xb90   :  { %v1959_v30 = vpop.f32.mrf.mxu0  ;;  %v1267_v31 = vpop.f32.mrf.mxu1 }
 0xb91   :  { %v1273_v32 = vadd.f32 %v1267_v31, %v2264_v47 }
 0xb92   :  { %v1966_v33 = vpop.f32.mrf.mxu1 }
 0xb93   :  { %2056 = vtanh.f32 %v1273_v32 }
 0xb94   :  { %v1270_v34 = vpop.f32.mrf.mxu1 }
 0xb96   :  { %v1967_v11 = vpop.f32.mrf.mxu1 }
 0xba0   :  { %v2057_v35 = vpop.eup %2056 }
 0xba1   :  { %1977 = vmatmul.mubr.msk.f32.vlgmr.msra.gmra.mxu0 %vm193_vm2, %v2057_v35  ;;  %v1348_v36 = vpack.c.bf16 %v2057_v35, %v2057_v35 }
 0xba2   :  { %1988 = vmatpush3.msra.mxu0 %v2248_v43  ;;  %1995 = vmatprep.mubr.msk.f32.mxu0 %vm2088_vm0, %v2087_v0 }
 0xba3   :  { %1984 = vmatmul.mubr.msk.bf16.vlgmr.msra.gmra.mxu1 %vm193_vm2, %v1348_v36  ;;  %1989 = vmatprep.subr.mxu0 %v2087_v0 }
 0xba4   :  { %1999 = vmatpush3.bf16.msra.mxu1 %v2224_v24  ;;  %1990 = vmatpush3.msra.mxu0 %v2250_v44 }
 0xba5   :  { %1991 = vmatprep.subr.mxu0 %v2087_v0  ;;  %2000 = vmatprep.subr.bf16.mxu1 %v2087_v0 }
 0xba6   :  { %1992 = vmatpush3.msra.mxu0 %v2254_v13  ;;  %2002 = vmatprep.mubr.msk.bf16.mxu1 %vm2088_vm0, %v2087_v0 }
 0xba7   :  { %1993 = vmatprep.subr.mxu0 %v2087_v0 }
 0xba8   :  { %2001 = vmatpush3.bf16.msra.mxu1 %v2228_v28  ;;  %1994 = vmatpush3.msra.mxu0 %v2258_v41 }
 0xba9   :  { %2006 = vmatprep.subr.mxu0 %v2087_v0 }
 0xc61   :  { %v1344_v24 = vpop.f32.mrf.mxu0 }
 0xc62   :  { %1603 = vrot.lane.b32.xlu0 %v1344_v24, %s2094_s6 }
 0xc63   :  { %v1978_v37 = vpop.f32.mrf.mxu0  ;;  %v1386_v38 = vpop.f32.mrf.mxu1 }
 0xc64   :  { %v1392_v39 = vadd.f32 %v1386_v38, %v2264_v47 }
 0xc65   :  { %v1985_v40 = vpop.f32.mrf.mxu1 }
 0xc66   :  { %2058 = vtanh.f32 %v1392_v39 }
 0xc67   :  { %v1389_v42 = vpop.f32.mrf.mxu1 }
 0xc69   :  { %v1986_v45 = vpop.f32.mrf.mxu1 }
 0xc73   :  { %v2059_v46 = vpop.eup %2058 }
 0xc74   :  { %1996 = vmatmul.mubr.msk.f32.vlgmr.msra.gmra.mxu0 %vm193_vm2, %v2059_v46  ;;  %v1467_v48 = vpack.c.bf16 %v2059_v46, %v2059_v46 }
 0xc75   :  { %2007 = vmatpush3.msra.mxu0 %v2248_v43  ;;  %2014 = vmatprep.mubr.msk.f32.mxu0 %vm2088_vm0, %v2087_v0 }
 0xc76   :  { %2003 = vmatmul.mubr.msk.bf16.vlgmr.msra.gmra.mxu1 %vm193_vm2, %v1467_v48  ;;  %2008 = vmatprep.subr.mxu0 %v2087_v0 }
 0xc77   :  { %2009 = vmatpush3.msra.mxu0 %v2250_v44 }
 0xc78   :  { %2010 = vmatprep.subr.mxu0 %v2087_v0 }
 0xc79   :  { %2011 = vmatpush3.msra.mxu0 %v2254_v13  ;;  %v1588_v13 = vpop.permute.xlu0 %1587 }
 0xc7a   :  { %2012 = vmatprep.subr.mxu0 %v2087_v0  ;;  %v1614_v58 = vsel %vm63_vm1, %v2285_v52, %v1588_v13 }
 0xc7b   :  { %2013 = vmatpush3.msra.mxu0 %v2258_v41  ;;  %v1596_v41 = vpop.permute.xlu1 %1595 }
 0xc7d   :  { %v1592_v56 = vpop.permute.xlu0 %1591 }
 0xc7f   :  { %v1600_v57 = vpop.permute.xlu1 %1599 }
 0xcd4   :  { %v1604_v59 = vpop.permute.xlu0 %1603 }
 0xd34   :  { %v1463_v28 = vpop.f32.mrf.mxu0 }
 0xd35   :  { %1607 = vrot.lane.b32.xlu1 %v1463_v28, %s2095_s7 }
 0xd36   :  { %v1997_v43 = vpop.f32.mrf.mxu0  ;;  %v1505_v49 = vpop.f32.mrf.mxu1 }
 0xd37   :  { %v1511_v50 = vadd.f32 %v1505_v49, %v2264_v47  ;;  %v1615_v47 = vsel %vm193_vm2, %v1614_v58, %v1592_v56 }
 0xd38   :  { %v2004_v51 = vpop.f32.mrf.mxu1  ;;  %v1617_v60 = vsel %vm1616_vm3, %v1615_v47, %v1596_v41 }
 0xd39   :  { %2060 = vtanh.f32 %v1511_v50  ;;  %v1619_v62 = vsel %vm1618_vm4, %v1617_v60, %v1600_v57 }
 0xd3a   :  { %v1508_v53 = vpop.f32.mrf.mxu1  ;;  %v1621_v63 = vsel %vm1620_vm5, %v1619_v62, %v1604_v59 }
 0xd3c   :  { %v2005_v54 = vpop.f32.mrf.mxu1 }
 0xd46   :  { %v2061_v44 = vpop.eup %2060 }
 0xd47   :  { %2015 = vmatmul.mubr.msk.f32.vlgmr.msra.gmra.mxu0 %vm193_vm2, %v2061_v44 }
 0xda7   :  { %v1608_v61 = vpop.permute.xlu1 %1607 }
 0xda8   :  { %v1623_v2 = vsel %vm1622_vm6, %v1621_v63, %v1608_v61 }
 0xe07   :  { %v1582_v55 = vpop.f32.mrf.mxu0 }
 0xe08   :  { %1611 = vrot.lane.b32.xlu0 %v1582_v55, %s2096_s8 }
 0xe09   :  { %v2016_v0 = vpop.f32.mrf.mxu0 }
 0xe7a   :  { %v1612_v3 = vpop.permute.xlu0 %1611 }
 0xe7b   :  { %v1625_v4 = vsel %vm1624_vm7, %v1623_v2, %v1612_v3 }
 0xe7c   :  { %v1630_v5 = vadd.f32 %v1670_v1, %v1625_v4 }
 0xe7e   :  { %1631 = vst [vmem:[%s2403_s2] sm:$0xff] %v1630_v5 }
 0xe7f   :  { %1636 = vsyncpa [#allocation3], 1 }

</bundles_post_ra>
